<compile_context>
chip_gen: v5e
topology: v5e:2x2
jax: 0.10.0
libtpu: 0.0.40
codegen_flags: <defaults>
</compile_context>

<pallas_src>
import functools

import jax
import jax.numpy as jnp
from jax.experimental import pallas as pl
from jax.experimental.pallas import tpu as pltpu


# --------------------------------------------------------------------------- #
# helpers
# --------------------------------------------------------------------------- #
def _make_divisible(v, divisor, min_value=None):
    if min_value is None:
        min_value = divisor
    new_v = max(min_value, int(v + divisor / 2) // divisor * divisor)
    if new_v < 0.9 * v:
        new_v += divisor
    return new_v


def _round_up(v, m):
    return (v + m - 1) // m * m


def _sublane_pack(dtype):
    """Second-minor tile for this dtype: 8 (f32), 16 (bf16), 32 (int8)."""
    return max(8, 32 // jnp.dtype(dtype).itemsize)


def _tpu_vmem_capacity():
    """Physical VMEM per core; drives per-generation budgets (v7x=64MiB, else 128MiB)."""
    try:
        info = pltpu.get_tpu_info()
        for name in ("vmem_capacity_bytes", "vmem_size_bytes", "vmem_bytes"):
            v = getattr(info, name, None)
            if v:
                return int(v)
    except Exception:
        pass
    return 64 << 20                      # conservative (v7x-sized) fallback


def _choose_lane_tile(hw, bytes_per_col, target_bytes, want_tiles=1):
    """Lane tile for a (rows, hw) streaming block.

    Returns either the full extent `hw` (always a legal block dim) or a multiple
    of 128 below it, sized so one block is ~target_bytes and, when
    `want_tiles > 1`, so the hw axis yields at least that many grid steps
    (cross-TensorCore split on v7x for N=1)."""
    if hw <= 128:
        return hw
    cap = max(128, (target_bytes // max(1, bytes_per_col)) // 128 * 128)
    if want_tiles > 1:
        cap = min(cap, max(128, _round_up(pl.cdiv(hw, want_tiles), 128)))
    if hw <= cap and want_tiles <= 1:
        return hw
    return min(cap, (hw // 128) * 128)


def _limit(work_bytes, cap_bytes):
    """Explicit scoped-VMEM limit: working set clamped to the per-gen cap."""
    return int(min(cap_bytes, max(32 << 20, work_bytes)))


def _hard_sigmoid(x):
    return jnp.clip(x + 3.0, 0.0, 6.0) * (1.0 / 6.0)


def _se_mlp_gate(pooled, w1t, b1, w2, b2):
    """SE MLP + hard_sigmoid on the VPU/XLU (no lane-width-1 MXU matvecs).

    pooled: (C, 1) f32; w1t: (C, R) = conv_reduce.weight.T; b1: (1, R);
    w2: (C, R) = conv_expand.weight; b2: (C, 1). Returns gate (C, 1) f32."""
    h = jnp.sum(pooled * w1t, axis=0, keepdims=True) + b1        # (1, R)
    h = jnp.maximum(h, 0.0)
    se = jnp.sum(w2 * h, axis=1, keepdims=True) + b2             # (C, 1)
    return _hard_sigmoid(se)


# --------------------------------------------------------------------------- #
# kernels
# --------------------------------------------------------------------------- #
def _se_fused_kernel(x_ref, w1t_ref, b1_ref, w2_ref, b2_ref, o_ref, *, inv_hw):
    """Fused fast path: pool + MLP + gate in one pass (x read once, written once)."""
    x = x_ref[0]                                                  # (C, HW), in-dtype
    pooled = jnp.sum(x, axis=1, keepdims=True, dtype=jnp.float32) * inv_hw
    gate = _se_mlp_gate(pooled, w1t_ref[...], b1_ref[...], w2_ref[...], b2_ref[...])
    o_ref[0] = x * gate.astype(x.dtype)                           # gate in input dtype


def _pool_partial_kernel(x_ref, psum_ref, *, t_size, hw, ragged):
    """Pass 1: partial channel sum of one (1, C, T) tile; mask the ragged last tile."""
    x = x_ref[0]                                                  # (C, T), in-dtype
    if ragged:
        limit = hw - pl.program_id(1) * t_size
        col = jax.lax.broadcasted_iota(jnp.int32, x.shape, 1)
        x = jnp.where(col < limit, x, jnp.zeros_like(x))
    psum_ref[0, 0] = jnp.sum(x, axis=1, keepdims=True, dtype=jnp.float32)  # (C, 1)


def _gate_kernel(x_ref, g_ref, o_ref):
    """Pass 2: pure gating, x block (rt, T2) * per-row gate (rt, 1)."""
    o_ref[...] = x_ref[...] * g_ref[...].astype(o_ref.dtype)


# --------------------------------------------------------------------------- #
# wrapper
# --------------------------------------------------------------------------- #
def squeeze_excite(x, w1, b1, w2, b2, *, force_two_pass=False, max_lane_tile=None):
    """x: (N, C, H, W); w1: (R, C) conv_reduce 1x1; b1: (R,);
    w2: (C, R) conv_expand 1x1; b2: (C,). Returns (N, C, H, W)."""
    N, C, H, W = x.shape
    R = w1.shape[0]
    HW = H * W
    dtype = x.dtype
    itemsize = jnp.dtype(dtype).itemsize
    pack = _sublane_pack(dtype)
    inv_hw = float(1.0 / HW)

    # ---- generation-aware budgets (v7x: 64 MiB/TC & 2 TCs; v5e/v6e: 128 MiB) ----
    vmem_cap = _tpu_vmem_capacity()
    big_vmem = vmem_cap >= (100 << 20)
    multi_tc = not big_vmem                          # 64 MiB VMEM => likely v7x (2 TCs)
    limit_cap = (96 << 20) if big_vmem else (48 << 20)
    tile_target = (4 << 20) if big_vmem else (3 << 20)

    hw128 = _round_up(HW, 128)
    c_pad = _round_up(C, pack)                        # sublane-packed channel extent
    slab = c_pad * hw128 * itemsize                   # one padded sample in VMEM
    w_bytes = 6 * _round_up(C, 8) * _round_up(R, 128) * 4
    # Fused working set: double-buffered in+out slabs + one f32 temp + weights.
    fused_work = 4 * slab + c_pad * hw128 * 4 + w_bytes + (4 << 20)

    use_fused = (not force_two_pass) and fused_work <= limit_cap
    if use_fused and multi_tc and N == 1 and slab > (1 << 20):
        # v7x, single sample: two-pass (3x traffic over 2 cores -> 1.5x effective)
        # beats fused (2x traffic on one core).
        use_fused = False

    x_flat = x.reshape(N, C, HW)                      # free reshape, no pad

    if use_fused:
        # ---------------- fused path: one HBM read, one HBM write of x ---------
        w1t = jnp.asarray(w1, jnp.float32).reshape(R, C).T        # (C, R)
        b1r = jnp.asarray(b1, jnp.float32).reshape(1, R)
        w2f = jnp.asarray(w2, jnp.float32).reshape(C, R)
        b2c = jnp.asarray(b2, jnp.float32).reshape(C, 1)
        weight_specs = [
            pl.BlockSpec((C, R), lambda n: (0, 0)),               # conv_reduce W^T
            pl.BlockSpec((1, R), lambda n: (0, 0)),               # conv_reduce bias
            pl.BlockSpec((C, R), lambda n: (0, 0)),               # conv_expand W
            pl.BlockSpec((C, 1), lambda n: (0, 0)),               # conv_expand bias
        ]
        out_flat = pl.pallas_call(
            functools.partial(_se_fused_kernel, inv_hw=inv_hw),
            out_shape=jax.ShapeDtypeStruct((N, C, HW), dtype),
            grid_spec=pltpu.PrefetchScalarGridSpec(
                num_scalar_prefetch=0,
                grid=(N,),
                in_specs=[pl.BlockSpec((1, C, HW), lambda n: (n, 0, 0))]
                         + weight_specs,
                out_specs=pl.BlockSpec((1, C, HW), lambda n: (n, 0, 0)),
            ),
            compiler_params=pltpu.CompilerParams(
                dimension_semantics=("parallel",),
                vmem_limit_bytes=_limit(fused_work, limit_cap)),
        )(x_flat, w1t, b1r, w2f, b2c)
        return out_flat.reshape(N, C, H, W)

    # ------------------------- two-pass path -----------------------------------
    want = 2 if (multi_tc and N == 1) else 1          # force >=2 hw tiles on v7x, N=1
    lane_cap = None
    if max_lane_tile is not None:
        lane_cap = max(128, (int(max_lane_tile) // 128) * 128)

    # Pass 1: per-(sample, hw-tile) partial channel sums; both grid axes parallel.
    T = _choose_lane_tile(HW, c_pad * itemsize, tile_target, want_tiles=want)
    if lane_cap is not None and lane_cap < T:
        T = lane_cap
    n_t = pl.cdiv(HW, T)
    ragged = (HW % T) != 0
    pool_work = 2 * c_pad * _round_up(T, 128) * itemsize + (4 << 20)
    psum = pl.pallas_call(
        functools.partial(_pool_partial_kernel, t_size=T, hw=HW, ragged=ragged),
        out_shape=jax.ShapeDtypeStruct((N, n_t, C, 1), jnp.float32),
        grid_spec=pltpu.PrefetchScalarGridSpec(
            num_scalar_prefetch=0,
            grid=(N, n_t),
            in_specs=[pl.BlockSpec((1, C, T), lambda n, t: (n, 0, t))],
            out_specs=pl.BlockSpec((1, 1, C, 1), lambda n, t: (n, t, 0, 0)),
        ),
        compiler_params=pltpu.CompilerParams(
            dimension_semantics=("parallel", "parallel"),
            vmem_limit_bytes=_limit(pool_work, limit_cap)),
    )(x_flat)

    # Tiny SE MLP + hard_sigmoid on (N, C) in plain JAX (negligible work).
    pooled = jnp.sum(psum[..., 0], axis=1) * inv_hw               # (N, C) f32
    w1f = jnp.asarray(w1, jnp.float32).reshape(R, C)
    w2f = jnp.asarray(w2, jnp.float32).reshape(C, R)
    h = jnp.maximum(pooled @ w1f.T + jnp.asarray(b1, jnp.float32)[None, :], 0.0)
    se = h @ w2f.T + jnp.asarray(b2, jnp.float32)[None, :]
    gate = _hard_sigmoid(se)                                      # (N, C) f32

    # Pass 2: gating over x viewed as (N*C, HW); ~3 MiB lane-dense blocks,
    # decoupled from the pass-1 tile, both grid axes parallel.
    rows = N * C
    T2 = _choose_lane_tile(HW, pack * itemsize, tile_target, want_tiles=want)
    if lane_cap is not None and lane_cap < T2:
        T2 = lane_cap
    rt = max(pack, min(256, (tile_target // max(1, T2 * itemsize)) // pack * pack))
    if rt > rows:
        rt = rows if rows < pack else (rows // pack) * pack       # never full-extent fallback
    gate_work = 4 * _round_up(rt, pack) * _round_up(T2, 128) * itemsize + (4 << 20)

    x2 = x_flat.reshape(rows, HW)
    g2 = gate.reshape(rows, 1)
    out2 = pl.pallas_call(
        _gate_kernel,
        out_shape=jax.ShapeDtypeStruct((rows, HW), dtype),
        grid_spec=pltpu.PrefetchScalarGridSpec(
            num_scalar_prefetch=0,
            grid=(pl.cdiv(rows, rt), pl.cdiv(HW, T2)),
            in_specs=[pl.BlockSpec((rt, T2), lambda r, t: (r, t)),
                      pl.BlockSpec((rt, 1), lambda r, t: (r, 0))],
            out_specs=pl.BlockSpec((rt, T2), lambda r, t: (r, t)),
        ),
        compiler_params=pltpu.CompilerParams(
            dimension_semantics=("parallel", "parallel"),
            vmem_limit_bytes=_limit(gate_work, limit_cap)),
    )(x2, g2)
    return out2.reshape(N, C, H, W)


# --------------------------------------------------------------------------- #
# reference + test
# --------------------------------------------------------------------------- #
def _reference(x, w1, b1, w2, b2):
    pooled = jnp.mean(x, axis=(2, 3))                             # (N, C)
    h = jnp.maximum(pooled @ w1.T + b1, 0.0)                      # (N, R)
    se = h @ w2.T + b2                                            # (N, C)
    gate = jnp.clip(se + 3.0, 0.0, 6.0) / 6.0
    return x * gate[:, :, None, None]


if __name__ == "__main__":
    # Module config: in_chs=4, se_ratio=0.25, divisor=4 -> reduced_chs=4
    N, C, H, W = 2, 4, 16, 16
    R = _make_divisible(C * 0.25, 4)

    key = jax.random.PRNGKey(0)
    kx, k1, k2, k3, k4, kx2 = jax.random.split(key, 6)
    x = jax.random.normal(kx, (N, C, H, W), dtype=jnp.float32)

    # Synthetic parameters (conv_reduce: (R, C) 1x1, conv_expand: (C, R) 1x1).
    w1 = jax.random.normal(k1, (R, C), dtype=jnp.float32) * 0.1
    b1 = jax.random.normal(k2, (R,), dtype=jnp.float32) * 0.1
    w2 = jax.random.normal(k3, (C, R), dtype=jnp.float32) * 0.1
    b2 = jax.random.normal(k4, (C,), dtype=jnp.float32) * 0.1

    ref = _reference(x, w1, b1, w2, b2)

    # 1) Default path: the feature map fits VMEM -> fused single-read kernel.
    out_fused = jax.block_until_ready(squeeze_excite(x, w1, b1, w2, b2))
    assert out_fused.shape == (N, C, H, W)
    assert jnp.allclose(out_fused, ref, atol=1e-5, rtol=1e-5), "fused path mismatch"

    # 2) Force the two-pass path (parallel partial-sum pool, then gating pass).
    out_tiled = jax.block_until_ready(
        squeeze_excite(x, w1, b1, w2, b2, force_two_pass=True))
    assert out_tiled.shape == (N, C, H, W)
    assert jnp.allclose(out_tiled, ref, atol=1e-5, rtol=1e-5), "tiled path mismatch"

    # 3) Ragged spatial extent (HW=225, not a multiple of 128): exercises the
    #    masked last pool tile + partial-block writeback (no wrapper pad/slice).
    H3 = W3 = 15
    x3 = jax.random.normal(kx2, (N, C, H3, W3), dtype=jnp.float32)
    ref3 = _reference(x3, w1, b1, w2, b2)
    out3_fused = jax.block_until_ready(squeeze_excite(x3, w1, b1, w2, b2))
    assert jnp.allclose(out3_fused, ref3, atol=1e-5, rtol=1e-5), "ragged fused mismatch"
    out3_tiled = jax.block_until_ready(
        squeeze_excite(x3, w1, b1, w2, b2, force_two_pass=True, max_lane_tile=128))
    assert jnp.allclose(out3_tiled, ref3, atol=1e-5, rtol=1e-5), "ragged tiled mismatch"

    print("KERNEL_OK")
</pallas_src>

<mosaic_0001>
module attributes {stable_mosaic.version = 11 : i64} {
  func.func @_se_fused_kernel(%arg0: i32, %arg1: memref<1x4x256xf32, #tpu.memory_space<vmem>>, %arg2: memref<4x4xf32, #tpu.memory_space<vmem>>, %arg3: memref<1x4xf32, #tpu.memory_space<vmem>>, %arg4: memref<4x4xf32, #tpu.memory_space<vmem>>, %arg5: memref<4x1xf32, #tpu.memory_space<vmem>>, %arg6: memref<1x4x256xf32, #tpu.memory_space<vmem>>) attributes {dimension_semantics = [#tpu.dimension_semantics<parallel>], iteration_bounds = array<i64: 2>, scalar_prefetch = 0 : i64, scratch_operands = 0 : i64, tpu.core_type = #tpu.core_type<tc>, window_params = [{transform_indices = @transform_0, window_bounds = array<i64: 1, 4, 256>}, {pipeline_mode = #tpu.pipeline_mode<synchronous>, transform_indices = @transform_1, window_bounds = array<i64: 4, 4>}, {pipeline_mode = #tpu.pipeline_mode<synchronous>, transform_indices = @transform_2, window_bounds = array<i64: 1, 4>}, {pipeline_mode = #tpu.pipeline_mode<synchronous>, transform_indices = @transform_3, window_bounds = array<i64: 4, 4>}, {pipeline_mode = #tpu.pipeline_mode<synchronous>, transform_indices = @transform_4, window_bounds = array<i64: 4, 1>}, {transform_indices = @transform_5, window_bounds = array<i64: 1, 4, 256>}]} {
    %c0 = arith.constant 0 : index
    %c0_0 = arith.constant 0 : index
    %c0_1 = arith.constant 0 : index
    %0 = vector.load %arg1[%c0, %c0_0, %c0_1] : memref<1x4x256xf32, #tpu.memory_space<vmem>>, vector<1x4x256xf32>
    %1 = vector.shape_cast %0 : vector<1x4x256xf32> to vector<4x256xf32>
    %cst = arith.constant dense<0.000000e+00> : vector<4xf32>
    %2 = vector.multi_reduction <add>, %1, %cst [1] : vector<4x256xf32> to vector<4xf32>
    %3 = vector.shape_cast %2 : vector<4xf32> to vector<4x1xf32>
    %cst_2 = arith.constant 3.906250e-03 : f32
    %4 = vector.broadcast %cst_2 : f32 to vector<4x1xf32>
    %5 = arith.mulf %3, %4 : vector<4x1xf32>
    %c0_3 = arith.constant 0 : index
    %c0_4 = arith.constant 0 : index
    %6 = vector.load %arg2[%c0_3, %c0_4] : memref<4x4xf32, #tpu.memory_space<vmem>>, vector<4x4xf32>
    %c0_5 = arith.constant 0 : index
    %c0_6 = arith.constant 0 : index
    %7 = vector.load %arg3[%c0_5, %c0_6] : memref<1x4xf32, #tpu.memory_space<vmem>>, vector<1x4xf32>
    %c0_7 = arith.constant 0 : index
    %c0_8 = arith.constant 0 : index
    %8 = vector.load %arg4[%c0_7, %c0_8] : memref<4x4xf32, #tpu.memory_space<vmem>>, vector<4x4xf32>
    %c0_9 = arith.constant 0 : index
    %c0_10 = arith.constant 0 : index
    %9 = vector.load %arg5[%c0_9, %c0_10] : memref<4x1xf32, #tpu.memory_space<vmem>>, vector<4x1xf32>
    %10 = vector.broadcast %5 : vector<4x1xf32> to vector<4x4xf32>
    %11 = arith.mulf %10, %6 : vector<4x4xf32>
    %cst_11 = arith.constant dense<0.000000e+00> : vector<4xf32>
    %12 = vector.multi_reduction <add>, %11, %cst_11 [0] : vector<4x4xf32> to vector<4xf32>
    %13 = vector.shape_cast %12 : vector<4xf32> to vector<1x4xf32>
    %14 = arith.addf %13, %7 : vector<1x4xf32>
    %cst_12 = arith.constant 0.000000e+00 : f32
    %15 = vector.broadcast %cst_12 : f32 to vector<1x4xf32>
    %16 = arith.maximumf %14, %15 : vector<1x4xf32>
    %17 = vector.broadcast %16 : vector<1x4xf32> to vector<4x4xf32>
    %18 = arith.mulf %8, %17 : vector<4x4xf32>
    %cst_13 = arith.constant dense<0.000000e+00> : vector<4xf32>
    %19 = vector.multi_reduction <add>, %18, %cst_13 [1] : vector<4x4xf32> to vector<4xf32>
    %20 = vector.shape_cast %19 : vector<4xf32> to vector<4x1xf32>
    %21 = arith.addf %20, %9 : vector<4x1xf32>
    %cst_14 = arith.constant 3.000000e+00 : f32
    %22 = vector.broadcast %cst_14 : f32 to vector<4x1xf32>
    %23 = arith.addf %21, %22 : vector<4x1xf32>
    %cst_15 = arith.constant 0.000000e+00 : f32
    %cst_16 = arith.constant 6.000000e+00 : f32
    %24 = vector.broadcast %cst_15 : f32 to vector<4x1xf32>
    %25 = arith.maximumf %24, %23 : vector<4x1xf32>
    %26 = vector.broadcast %cst_16 : f32 to vector<4x1xf32>
    %27 = arith.minimumf %26, %25 : vector<4x1xf32>
    %cst_17 = arith.constant 0.166666672 : f32
    %28 = vector.broadcast %cst_17 : f32 to vector<4x1xf32>
    %29 = arith.mulf %27, %28 : vector<4x1xf32>
    %30 = vector.broadcast %29 : vector<4x1xf32> to vector<4x256xf32>
    %31 = arith.mulf %1, %30 : vector<4x256xf32>
    %c0_18 = arith.constant 0 : index
    %c0_19 = arith.constant 0 : index
    %c0_20 = arith.constant 0 : index
    %32 = vector.load %arg6[%c0_18, %c0_19, %c0_20] : memref<1x4x256xf32, #tpu.memory_space<vmem>>, vector<1x4x256xf32>
    %33 = vector.shape_cast %32 : vector<1x4x256xf32> to vector<4x256xf32>
    %34 = vector.shape_cast %31 : vector<4x256xf32> to vector<1x4x256xf32>
    tpu.vector_store %arg6[%c0_18, %c0_19, %c0_20], %34 {strides = array<i32>} : memref<1x4x256xf32, #tpu.memory_space<vmem>>, vector<1x4x256xf32>,
    return
  }
  func.func @transform_0(%arg0: i32) -> (i32, i32, i32) {
    %c0_i32 = arith.constant 0 : i32
    %c0_i32_0 = arith.constant 0 : i32
    %c0_i32_1 = arith.constant 0 : i32
    return %arg0, %c0_i32, %c0_i32_0 : i32, i32, i32
  }
  func.func @transform_1(%arg0: i32) -> (i32, i32) {
    %c0_i32 = arith.constant 0 : i32
    %c0_i32_0 = arith.constant 0 : i32
    %c0_i32_1 = arith.constant 0 : i32
    return %c0_i32, %c0_i32_0 : i32, i32
  }
  func.func @transform_2(%arg0: i32) -> (i32, i32) {
    %c0_i32 = arith.constant 0 : i32
    %c0_i32_0 = arith.constant 0 : i32
    %c0_i32_1 = arith.constant 0 : i32
    return %c0_i32, %c0_i32_0 : i32, i32
  }
  func.func @transform_3(%arg0: i32) -> (i32, i32) {
    %c0_i32 = arith.constant 0 : i32
    %c0_i32_0 = arith.constant 0 : i32
    %c0_i32_1 = arith.constant 0 : i32
    return %c0_i32, %c0_i32_0 : i32, i32
  }
  func.func @transform_4(%arg0: i32) -> (i32, i32) {
    %c0_i32 = arith.constant 0 : i32
    %c0_i32_0 = arith.constant 0 : i32
    %c0_i32_1 = arith.constant 0 : i32
    return %c0_i32, %c0_i32_0 : i32, i32
  }
  func.func @transform_5(%arg0: i32) -> (i32, i32, i32) {
    %c0_i32 = arith.constant 0 : i32
    %c0_i32_0 = arith.constant 0 : i32
    %c0_i32_1 = arith.constant 0 : i32
    return %arg0, %c0_i32, %c0_i32_0 : i32, i32, i32
  }
}

</mosaic_0001>

<bundles_post_ra>
// kernel: tpu_custom_call.1
= control target key start
LH: loop header
LB: loop body
LE: loop exit
PB: predicated region body
PF: predicated region fallthrough
CT: control target
= control target key end

     0   :  { %10 = vsyncpa [#allocation3], 0  ;;  %s800_s0 = inlined_call_operand.hbm [shape: f32[2,4,256], index: 0, kind: input, shape index: {}]   ;;  %s801_s1 = inlined_call_operand.vmem [shape: f32[4,4], index: 1, kind: input, shape index: {}]   ;;  %s802_s2 = inlined_call_operand.vmem [shape: f32[1,4], index: 2, kind: input, shape index: {}]   ;;  %s803_s3 = inlined_call_operand.hbm [shape: f32[4,4], index: 3, kind: input, shape index: {}]   ;;  %s804_s4 = inlined_call_operand.vmem [shape: f32[4,1], index: 4, kind: input, shape index: {}]   ;;  %s805_s5 = inlined_call_operand.hbm [shape: f32[2,4,256], index: 5, kind: output, shape index: {}]  }
   0x1   :  { %12 = vsyncpa [#allocation3 + $0x1], 0 }
   0x2   :  { %13 = vsyncpa [#allocation6], 0 }
   0x3   :  { %14 = vsyncpa [#allocation4], 0 }
   0x4   :  { %16 = vsyncpa [#allocation4 + $0x1], 0  ;;  %s649_s18 = smov 0   ;;  %s651_s19 = smov 0  }
   0x5   :  { %s653_s20 = smov 0   ;;  %s655_s21 = smov 0  }
   0x6 LB: > { %s670_s22 = sadd.s32 4294967295, %s614_s21   ;;  %s405_s23 = sadd.s32 4294967294, %s614_s21   ;;  %s614_s21 = sphi %s655_s21, %s815_s21   ;;  %s610_s20 = sphi %s653_s20, %s814_s20   ;;  %s606_s19 = sphi %s651_s19, %s813_s19   ;;  %s602_s18 = sphi %s649_s18, %s812_s18  }
   0x7   : > { %p42_p0 = scmp.ne.s32.totalorder %s606_s19, %s602_s18  ;;  %p43_p1 = scmp.eq.s32.totalorder %s670_s22, 0 }
   0x8   : > { %p150_p2 = scmp.eq.s32.totalorder %s670_s22, 1  ;;  %p156_p3 = scmp.eq.s32.totalorder %s405_s23, 1 }
   0x9   : > { %p679_p4 = por %p43_p1, %p42_p0  ;;  %p406_p5 = scmp.ge.s32.totalorder %s614_s21, 1 }
   0xa   : > { %p684_p6 = por %p156_p3, %p42_p0  ;;  %p163_p7 = scmp.lt.s32.totalorder %s614_s21, 3 }
   0xb   : > { %s181_s28 = sshll.u32 %s803_s3, 4  ;;  %s616_s30 = smov [#allocation5]   ;;  %s182_s28 = int_to_ptr.hbm [resolvable:$true] %s181_s28 }
   0xc   : > { %p692_p8 = pnand %p406_p5, %p163_p7  ;;  %s183_s6 = sshll.u32 %s616_s30, 4  ;;  %s184_s6 = int_to_ptr.vmem [resolvable:$true] %s183_s6 }
   0xd   : > { %s702_s7 = sadd.s32 1, %s614_s21   ;;  %s29_s8 = sadd.s32 1, %s610_s20 }
   0xe   : > { %p431_p10 = pneg %p692_p8  ;;  %s26_s9 = ssub.s32 %s614_s21, %s702_s7 }
   0xf   : > { %p27_p12 = scmp.eq.s32.totalorder %s26_s9, 0  ;;  %p36_p13 = scmp.ne.s32.totalorder %s610_s20, %s606_s19 }
  0x10   : > { %p432_p11 = pnand %p431_p10, %p43_p1  ;;  %p37_p0 = scmp.eq.s32.totalorder %s614_s21, 0 }
  0x11   : > { %s711_s10 = scalar_select %p27_p12, %s610_s20, %s29_s8  }
  0x12   : > { %434 = dma.hbm_to_vmem [thread:$0]  (!%p432_p11), %s182_s28, 64, %s184_s6, [#allocation6]  }
  0x13   : > { %p715_p3 = por %p150_p2, %p36_p13  ;;  %p444_p5 = scmp.lt.s32.totalorder %s614_s21, 2 }
  0x14   : > { %s197_s12 = sand.u32 1, %s610_s20   ;;  %s421_s13 = sshll.u32 %s614_s21, 3 }
  0x15   : > { %p38_p7 = por %p37_p0, %p36_p13  ;;  %s409_s14 = sshll.u32 %s197_s12, 3 }
  0x16   : > { %s206_s17 = scalar_lea.hbm %s800_s0, %s421_s13  ;;  %s201_s26 = scalar_lea.vmem [#allocation2], %s409_s14 }
  0x17   : > { %s208_s23 = sshll.u32 %s206_s17, 4  ;;  %s210_s27 = sshll.u32 %s201_s26, 4  ;;  %s209_s23 = int_to_ptr.hbm [resolvable:$true] %s208_s23  ;;  %s211_s27 = int_to_ptr.vmem [resolvable:$true] %s210_s27 }
  0x18   : > { %p725_p10 = pnand %p444_p5, %p38_p7  ;;  %s198_s30 = scalar_lea.sflag [#allocation3], %s197_s12 }
  0x19   : > { %s514_s6 = sshra.s32 %s209_s23, 4  ;;  %s521_s14 = scalar_lea.hbm %s800_s0, 16  ;;  %s515_s6 = int_to_ptr.hbm [resolvable:$true] %s514_s6 }
  0x1a   : > { %s516_s8 = scalar_lea.hbm %s515_s6, 8  ;;  %p518_p11 = pneg %p725_p10 }
  0x1b   : > { %p517_p2 = scmp.ne.s32.totalorder %s515_s6, %s516_s8  ;;  %p522_p0 = scmp.lt.s32.totalorder %s515_s6, %s800_s0 }
  0x1c   : > { %p523_p5 = scmp.lt.s32.totalorder %s521_s14, %s516_s8 }
  0x1d   : > { %p519_p12 = pnand %p518_p11, %p517_p2 }
  0x1e   : > { %p524_p7 = por %p523_p5, %p522_p0 }
  0x1f   : > { %p520_p13 = pneg %p519_p12 }
  0x21   : > { %p525_p9 = pnand %p524_p7, %p520_p13 }
  0x23   : > { %528 = shalt.err (!%p525_p9)
}
  0x24   : > { %438 = dma.hbm_to_vmem [thread:$0]  (!%p725_p10), %s209_s23, 128, %s211_s27, %s198_s30  }
  0x25   : > { %219 = sbr.rel (%p692_p8) target bundleno = 447 (0x1bf), region = 40  ;;  %s742_s12 = sand.u32 (!%p692_p8), 1, %s606_s19  }
  0x26   : > { %s413_s17 = sshll.u32 (!%p692_p8), %s742_s12, 3  ;;  %s222_s26 = scalar_lea.sflag (!%p692_p8), [#allocation3], %s742_s12 }
  0x27   : > { %s225_s6 = scalar_lea.vmem (!%p692_p8), [#allocation2], %s413_s17 }
  0x2a   : > { %589 = dma.done.wait (%p679_p4), %s222_s26, 128  }
  0x2b   : > { %591 = vsyncadd (%p679_p4), %s222_s26, 4294967168 }
  0x2c   : > { %593 = dma.done.wait (%p43_p1), [#allocation6], 64  }
  0x2d   : > { %595 = vsyncadd (%p43_p1), [#allocation6], 4294967232  ;;  %v258_v0 = vld [vmem:[%s225_s6] sm:$0xff]  ;;  %vm265_vm0 = vcmask 1043456   ;;  %v272_v6 = vld [vmem:[%s801_s1] sm:$0xf] }
  0x2e   : > { %260 = vst [vmem:[#allocation1] ss:$2 sm:$0xff] %v258_v0  ;;  %vm277_vm1 = vcmask 27648   ;;  %v273_v16 = vld [vmem:[%s802_s2] sm:$0x1]  ;;  %v617_v24 = vmov 0  }
  0x2f   : > { %v274_v20 = vld [vmem:[#allocation5] sm:$0xf]  ;;  %482 = vset.pattern.permute.xlu1 %v617_v24  ;;  %483 = vset.pattern.permute.xlu0 %v617_v24  ;;  %v275_v25 = vld [vmem:[%s804_s4] sm:$0xf]  ;;  %v618_v32 = vmov 839922192  }
  0x30   : > { %v302_v33 = vunpack.c.l.s4 %v618_v32  ;;  %s422_s8 = sshll.u32 %s670_s22, 3  ;;  %s257_s15 = scalar_lea.vmem [#allocation7], %s413_s17 }
  0x31   : > { %s320_s14 = scalar_lea.hbm %s805_s5, %s422_s8  ;;  %s322_s16 = sshll.u32 %s257_s15, 4  ;;  %s323_s16 = int_to_ptr.vmem [resolvable:$true] %s322_s16 }
  0x32   : > { %v303_v34 = vunpack.c.0.s8 %v302_v33  ;;  %s324_s26 = sshll.u32 %s320_s14, 4  ;;  %s309_s6 = scalar_lea.sflag [#allocation4], %s742_s12  ;;  %s325_s26 = int_to_ptr.hbm [resolvable:$true] %s324_s26 }
  0x33   : > { %s558_s29 = sshra.s32 %s325_s26, 4  ;;  %s564_s27 = scalar_lea.hbm %s805_s5, 16  ;;  %s559_s29 = int_to_ptr.hbm [resolvable:$true] %s558_s29 }
  0x34   : > { %s560_s22 = scalar_lea.hbm %s559_s29, 8  ;;  %p565_p9 = scmp.lt.s32.totalorder %s559_s29, %s805_s5 }
  0x35   : > { %v261_v1 = vld.sshfl [vmem:[#allocation1] sm:$0xff pattern:$0x75316420]  ;;  %v262_v2 = vld.sshfl [vmem:[#allocation1 + $0x8] sm:$0xff pattern:$0x75316420]  ;;  %p561_p1 = scmp.ne.s32.totalorder %s559_s29, %s560_s22  ;;  %p566_p10 = scmp.lt.s32.totalorder %s564_s27, %s560_s22 }
  0x36   : > { %v266_v3 = vsel %vm265_vm0, %v261_v1, 0.0  ;;  %v267_v4 = vsel %vm265_vm0, %v262_v2, 0.0 }
  0x37   : > { %v268_v5 = vadd.f32 %v267_v4, %v266_v3  ;;  %p562_p4 = pnand %p561_p1, %p715_p3  ;;  %p567_p2 = por %p566_p10, %p565_p9 }
  0x39   : > { %269 = vadd.xlane.f32.xlu0 %v268_v5  ;;  %p563_p8 = pneg %p562_p4 }
  0x3b   : > { %p568_p11 = pnand %p567_p2, %p563_p8 }
  0xac   : > { %v270_v7 = vpop.xlane.xlu0 %269 }
  0xad   : > { %v271_v8 = vmul.f32 0.00390625, %v270_v7 }
  0xaf   : > { %v276_v9 = vmul.f32 %v272_v6, %v271_v8 }
  0xb1   : > { %v278_v10 = vsel %vm277_vm1, %v276_v9, 0.0 }
  0xb2   : > { %v279_v11 = vrot.slane %v278_v10, 4 }
  0xb4   : > { %v280_v12 = vadd.f32 %v279_v11, %v278_v10 }
  0xb6   : > { %v281_v13 = vrot.slane %v280_v12, 2 }
  0xb8   : > { %v282_v14 = vadd.f32 %v281_v13, %v280_v12 }
  0xba   : > { %v283_v15 = vrot.slane %v282_v14, 1 }
  0xbc   : > { %v284_v17 = vadd.f32 %v283_v15, %v282_v14 }
  0xbe   : > { %v285_v18 = vadd.f32 %v284_v17, %v273_v16 }
  0xc0   : > { %v286_v19 = vmax.f32 %v285_v18, 0.0 }
  0xc2   : > { %v287_v21 = vperm.slane %v286_v19, 0 }
  0xc4   : > { %v288_v22 = vmul.f32 %v287_v21, %v274_v20 }
  0xc6   : > { %v289_v23 = vsel %vm277_vm1, %v288_v22, 0.0 }
  0xc7   : > { %290 = vadd.xlane.f32.xlu0 %v289_v23 }
 0x13a   : > { %v291_v26 = vpop.xlane.xlu0 %290 }
 0x13b   : > { %v292_v27 = vadd.f32 %v291_v26, %v275_v25 }
 0x13d   : > { %v293_v28 = vadd.f32 3.0, %v292_v27 }
 0x13f   : > { %v294_v29 = vmax.f32 %v293_v28, 0.0 }
 0x141   : > { %v295_v30 = vmin.f32 %v294_v29, 6.0 }
 0x143   : > { %v296_v31 = vmul.f32 0.16666667, %v295_v30 }
 0x145   : > { %299 = vperm.xlu1 %482, %v296_v31  }
 0x1b7   : > { %v300_v35 = vpop.permute.xlu1 %299 }
 0x1b8   : > { %v304_v36 = vperm.slane %v300_v35, %v303_v34 }
 0x1ba   : > { %v306_v37 = vmul.f32 %v304_v36, %v258_v0 }
 0x1bc   : > { %307 = vst [vmem:[%s257_s15] sm:$0xff] %v306_v37 }
 0x1bd   : > { %571 = shalt.err (!%p568_p11)
}
 0x1be   : > { %429 = dma.vmem_to_hbm [thread:$0]  (%p715_p3), %s323_s16, 128, %s325_s26, %s309_s6  }
 0x1bf PF: > { %s336_s12 = sand.u32 1, %s602_s18   ;;  %p811_p12 = scmp.ge.s32.totalorder %s614_s21, 2 }
 0x1c0   : > { %s337_s30 = scalar_lea.sflag [#allocation4], %s336_s12 }
 0x1c1   : > { %p440_p13 = pnand %p811_p12, %p684_p6 }
 0x1c3   : > { %p441_p0 = pneg %p440_p13 }
 0x1c5   : > { %597 = dma.done.wait (%p441_p0), %s337_s30, 128  }
 0x1c6   : > { %599 = vsyncadd (%p441_p0), %s337_s30, 4294967168  ;;  %p19_p5 = scmp.ge.s32.totalorder %s702_s7, 4   ;;  %s812_s18 = smov %s606_s19 }
 0x1c7   : > { %s813_s19 = smov %s610_s20  ;;  %s814_s20 = smov %s711_s10 }
 0x1c8   : > { %s815_s21 = smov %s702_s7  ;;  %21 = sbr.rel (!%p19_p5) target bundleno = 6 (0x6), region = 89 }
 0x1cd   :  { %343 = vsyncpa [#allocation3], 1 }
 0x1ce   :  { %345 = vsyncpa [#allocation3 + $0x1], 1 }
 0x1cf   :  { %346 = vsyncpa [#allocation6], 1 }
 0x1d0   :  { %347 = vsyncpa [#allocation4], 1 }
 0x1d1   :  { %349 = vsyncpa [#allocation4 + $0x1], 1 }

</bundles_post_ra>
